<compile_context>
chip_gen: v7x
topology: tpu7x:2x2x1
jax: 0.10.0
libtpu: 0.0.40
codegen_flags: <defaults>
</compile_context>

<pallas_src>
import functools

import jax
import jax.numpy as jnp
from jax.experimental import pallas as pl
from jax.experimental.pallas import tpu as pltpu


def _swish_kernel(x_ref, o_ref, *, beta):
    x = x_ref[...].astype(jnp.float32)
    # Swish / SiLU: x * sigmoid(beta * x).  sigmoid lowers to the EUP
    # (exp + reciprocal), leaving VALU slots mostly free; this op is
    # HBM-bound, so no compute micro-optimization is needed.
    o_ref[...] = (x * jax.nn.sigmoid(beta * x)).astype(o_ref.dtype)


def _round_up(a, b):
    return (a + b - 1) // b * b


# Preferred last-dim widths (all multiples of 128 -> unmasked full-width stores).
_COLS_CANDIDATES = (2048, 1024, 512, 256, 128)
_FALLBACK_COLS = 512


@functools.partial(jax.jit, static_argnames=("beta",))
def swish(x, beta=1.0):
    """Elementwise Swish via a tiled, lane-dense Pallas TPU kernel.

    Works for any input shape/dtype.  For the common case (x.size a multiple
    of 128) no padding or slicing is performed; the flat array is viewed as a
    [rows, cols] slab and processed in 2-4 MiB row blocks.
    """
    orig_shape = x.shape
    dtype = x.dtype
    n = x.size
    itemsize = jnp.dtype(dtype).itemsize

    # ---- choose a lane-dense 2-D layout, avoiding pad/slice when possible ----
    cols = None
    for c in _COLS_CANDIDATES:
        if n % c == 0:
            cols = c
            break

    flat = x.reshape(-1)
    if cols is None:
        # Rare unaligned case: pad to a multiple of 128 lanes.  Zero-padding is
        # safe because swish(0) == 0 and the padded tail is sliced off.
        # TODO(synk): for very large unaligned inputs, mask the last block
        # in-kernel (scalar-prefetched n + pltpu.store mask) to avoid the
        # extra pad/slice HBM passes.
        cols = _FALLBACK_COLS
        padded = _round_up(n, cols)
        flat = jnp.pad(flat, (0, padded - n))
    else:
        padded = n
    rows = padded // cols
    x2d = flat.reshape(rows, cols)

    # ---- per-generation block sizing ----
    kind = ""
    try:
        kind = jax.devices()[0].device_kind.lower()
    except Exception:
        pass
    # v5e: keep blocks at ~2 MiB (16 MiB scoped-VMEM default, 4 buffers = 8 MiB).
    # v6e/v7x (and unknown): ~4 MiB blocks (4 buffers = 16 MiB, fits 32 MiB default).
    target_bytes = (2 << 20) if "v5" in kind else (4 << 20)
    # Parts with 2 TensorCores per JAX device benefit from a multi-block grid.
    multi_core = any(v in kind for v in ("v7", "v4", "v3"))

    bytes_per_row = cols * itemsize
    max_tile_rows = max(8, (target_bytes // bytes_per_row) // 8 * 8)

    if rows <= max_tile_rows:
        if multi_core and rows >= 64:
            # Split mid-size inputs into ~8 row blocks so the "parallel" grid
            # axis shards across both TensorCores.
            tile_rows = _round_up(pl.cdiv(rows, 8), 8)
        else:
            # Single block == full array: minimal per-step overhead, and the
            # (8,128) block constraint is trivially satisfied.
            tile_rows = rows
    else:
        tile_rows = max_tile_rows
    grid_len = pl.cdiv(rows, tile_rows)

    out2d = pl.pallas_call(
        functools.partial(_swish_kernel, beta=float(beta)),
        out_shape=jax.ShapeDtypeStruct((rows, cols), dtype),
        grid_spec=pltpu.PrefetchScalarGridSpec(
            num_scalar_prefetch=0,
            grid=(grid_len,),
            in_specs=[pl.BlockSpec((tile_rows, cols), lambda i: (i, 0))],
            out_specs=pl.BlockSpec((tile_rows, cols), lambda i: (i, 0)),
        ),
        compiler_params=pltpu.CompilerParams(
            dimension_semantics=("parallel",),
        ),
    )(x2d)

    out = out2d.reshape(-1)
    if padded != n:
        out = out[:n]
    return out.reshape(orig_shape)


def swish_reference(x, beta=1.0):
    xf = x.astype(jnp.float32)
    return (xf * jax.nn.sigmoid(beta * xf)).astype(x.dtype)


if __name__ == "__main__":
    key = jax.random.PRNGKey(0)
    k1, k2, k3, k4 = jax.random.split(key, 4)

    # Activation-module style input: [B, C, H, W] = [2, 4, 16, 16].
    x = jax.random.normal(k1, (2, 4, 16, 16), jnp.float32)
    out = jax.block_until_ready(swish(x, 1.0))
    ref = swish_reference(x, 1.0)
    assert out.shape == x.shape and out.dtype == x.dtype
    assert jnp.allclose(out, ref, atol=1e-6, rtol=1e-6), "mismatch (4D f32)"

    # Larger input that exercises the multi-block grid on multi-core parts.
    y = jax.random.normal(k2, (256, 512), jnp.float32)
    out_y = jax.block_until_ready(swish(y, 1.0))
    assert jnp.allclose(out_y, swish_reference(y, 1.0), atol=1e-6, rtol=1e-6), \
        "mismatch (multi-block)"

    # Unaligned size -> pad fallback path.
    z = jax.random.normal(k3, (1000,), jnp.float32)
    out_z = jax.block_until_ready(swish(z, 1.0))
    assert out_z.shape == z.shape
    assert jnp.allclose(out_z, swish_reference(z, 1.0), atol=1e-6, rtol=1e-6), \
        "mismatch (unaligned)"

    # bf16 pass-through (bf16 I/O, f32 math) + non-default beta.
    w = jax.random.normal(k4, (4, 8, 128), jnp.bfloat16)
    out_w = jax.block_until_ready(swish(w, 1.7))
    ref_w = swish_reference(w, 1.7)
    assert out_w.dtype == jnp.bfloat16
    assert jnp.allclose(out_w.astype(jnp.float32), ref_w.astype(jnp.float32),
                        atol=5e-2), "mismatch (bf16 / beta)"

    print("KERNEL_OK")
</pallas_src>

<mosaic_0001>
module attributes {stable_mosaic.version = 11 : i64} {
  func.func @_swish_kernel(%arg0: i32, %arg1: memref<1x2048xf32, #tpu.memory_space<vmem>>, %arg2: memref<1x2048xf32, #tpu.memory_space<vmem>>) attributes {dimension_semantics = [#tpu.dimension_semantics<parallel>], iteration_bounds = array<i64: 1>, scalar_prefetch = 0 : i64, scratch_operands = 0 : i64, tpu.core_type = #tpu.core_type<tc>, window_params = [{transform_indices = @transform_0, window_bounds = array<i64: 1, 2048>}, {transform_indices = @transform_1, window_bounds = array<i64: 1, 2048>}]} {
    %c0 = arith.constant 0 : index
    %c0_0 = arith.constant 0 : index
    %0 = vector.load %arg1[%c0, %c0_0] : memref<1x2048xf32, #tpu.memory_space<vmem>>, vector<1x2048xf32>
    %cst = arith.constant 1.000000e+00 : f32
    %1 = vector.broadcast %cst : f32 to vector<1x2048xf32>
    %2 = arith.mulf %1, %0 : vector<1x2048xf32>
    %3 = arith.negf %2 : vector<1x2048xf32>
    %4 = math.exp %3 : vector<1x2048xf32>
    %cst_1 = arith.constant 1.000000e+00 : f32
    %5 = vector.broadcast %cst_1 : f32 to vector<1x2048xf32>
    %6 = arith.addf %5, %4 : vector<1x2048xf32>
    %7 = arith.divf %5, %6 : vector<1x2048xf32>
    %8 = arith.mulf %0, %7 : vector<1x2048xf32>
    %c0_2 = arith.constant 0 : index
    %c0_3 = arith.constant 0 : index
    %9 = vector.load %arg2[%c0_2, %c0_3] : memref<1x2048xf32, #tpu.memory_space<vmem>>, vector<1x2048xf32>
    tpu.vector_store %arg2[%c0_2, %c0_3], %8 {strides = array<i32>} : memref<1x2048xf32, #tpu.memory_space<vmem>>, vector<1x2048xf32>,
    return
  }
  func.func @transform_0(%arg0: i32) -> (i32, i32) {
    %c0_i32 = arith.constant 0 : i32
    %c0_i32_0 = arith.constant 0 : i32
    return %arg0, %c0_i32 : i32, i32
  }
  func.func @transform_1(%arg0: i32) -> (i32, i32) {
    %c0_i32 = arith.constant 0 : i32
    %c0_i32_0 = arith.constant 0 : i32
    return %arg0, %c0_i32 : i32, i32
  }
}

</mosaic_0001>

<bundles_post_ra>
// kernel: swish.1
= control target key start
LH: loop header
LB: loop body
LE: loop exit
PB: predicated region body
PF: predicated region fallthrough
CT: control target
= control target key end

     0   :  { %s62_s0 = inlined_call_operand.vmem [shape: f32[1,2048], index: 0, kind: input, shape index: {}]   ;;  %s63_s1 = inlined_call_operand.vmem [shape: f32[1,2048], index: 1, kind: output, shape index: {}]  }
   0x1   :  { %v8_v0 = vld [vmem:[%s62_s0] sm:$0xff]  ;;  %v9_v1 = vld [vmem:[%s62_s0 + $0x8] sm:$0xff] }
   0x2   :  { %v30_v2 = vmul.f32 -1.442695, %v8_v0  ;;  %v31_v3 = vmul.f32 -1.442695, %v9_v1 }
   0x4   :  { %32 = vpow2.f32 %v30_v2 }
   0x5   :  { %34 = vpow2.f32 %v31_v3 }
   0xe   :  { %v33_v4 = vpop.eup %32 }
   0xf   :  { %v35_v5 = vpop.eup %34  ;;  %v16_v6 = vadd.f32 1.0, %v33_v4 }
  0x10   :  { %v17_v7 = vadd.f32 1.0, %v35_v5 }
  0x11   :  { %36 = vrcp.f32 %v16_v6 }
  0x12   :  { %38 = vrcp.f32 %v17_v7 }
  0x1b   :  { %v37_v8 = vpop.eup %36 }
  0x1c   :  { %v39_v9 = vpop.eup %38  ;;  %v22_v10 = vmul.f32 %v37_v8, %v8_v0 }
  0x1d   :  { %v23_v11 = vmul.f32 %v39_v9, %v9_v1 }
  0x1e   :  { %24 = vst [vmem:[%s63_s1] sm:$0xff] %v22_v10 }
  0x1f   :  { %25 = vst [vmem:[%s63_s1 + $0x8] sm:$0xff] %v23_v11 }

</bundles_post_ra>
